<compile_context>
chip_gen: v7x
topology: tpu7x:2x2x1
jax: 0.10.0
libtpu: 0.0.40
codegen_flags: <defaults>
</compile_context>

<pallas_src>
import functools

import jax
import jax.numpy as jnp
from jax.experimental import pallas as pl
from jax.experimental.pallas import tpu as pltpu


def _round_up(x, m):
    return ((x + m - 1) // m) * m


# ---------------------------------------------------------------------------
# Stage 1: hidden activations  h2 = tanh( tanh(x @ W1 + b1) @ W2 + b2 )
# Grid: batch tiles only ("parallel").  W1/W2/b1/b2 BlockSpecs are
# grid-invariant so they are DMA'd once.  Output is written in the compute
# dtype so Stage 2 never re-casts it.
# ---------------------------------------------------------------------------
def _hidden_kernel(x_ref, w1_ref, b1_ref, w2_ref, b2_ref, h2_ref):
    h1 = jnp.tanh(
        jnp.dot(x_ref[...], w1_ref[...], preferred_element_type=jnp.float32)
        + b1_ref[...]
    )
    h2 = jnp.tanh(
        jnp.dot(h1.astype(w2_ref.dtype), w2_ref[...],
                preferred_element_type=jnp.float32)
        + b2_ref[...]
    )
    h2_ref[...] = h2.astype(h2_ref.dtype)


# ---------------------------------------------------------------------------
# Stage 2: logits = h2 @ W3 + b3
# Grid: (vocab tiles OUTER, batch tiles INNER).  W3/b3 block index depends
# only on the outer (vocab) axis -> each vocab tile of W3 is fetched from HBM
# exactly once, regardless of how many batch tiles there are.
# ---------------------------------------------------------------------------
def _logits_kernel(h2_ref, w3_ref, b3_ref, out_ref):
    out_ref[...] = (
        jnp.dot(h2_ref[...], w3_ref[...], preferred_element_type=jnp.float32)
        + b3_ref[...]
    ).astype(out_ref.dtype)


@functools.partial(jax.jit,
                   static_argnames=("block_b", "block_v", "use_bf16",
                                    "out_dtype"))
def nnlm_forward(x, w1, b1, w2, b2, w3, b3, *,
                 block_b=512, block_v=2048, use_bf16=True,
                 out_dtype=jnp.float32):
    """x: (B, input_dim*window_size).  Returns logits (B, len_vocab)."""
    B, in_dim = x.shape
    h1_dim = w1.shape[1]
    h2_dim = w2.shape[1]
    vocab = w3.shape[1]

    # Batch tile: multiple of 8 (sublane); vocab tile: multiple of 128 (lane),
    # both clamped to the (padded) problem size.
    tb = _round_up(min(block_b, _round_up(B, 8)), 8)
    tv = _round_up(min(block_v, _round_up(vocab, 128)), 128)
    # If the whole batch would land in a single tile, split it in two so both
    # TensorCores of a megacore part (v7x) get batch-axis work too.
    if B > 8 and _round_up(B, 8) <= tb:
        tb = _round_up(-(-B // 2), 8)

    Bp = _round_up(B, tb)
    Vp = _round_up(vocab, tv)
    nbt = Bp // tb
    nvt = Vp // tv

    compute_dtype = jnp.bfloat16 if use_bf16 else jnp.float32
    cbytes = 2 if use_bf16 else 4
    obytes = jnp.dtype(out_dtype).itemsize

    xp = x.astype(compute_dtype)
    if Bp != B:
        xp = jnp.pad(xp, ((0, Bp - B), (0, 0)))

    w3p, b3p = w3, b3
    if Vp != vocab:
        w3p = jnp.pad(w3, ((0, 0), (0, Vp - vocab)))
        b3p = jnp.pad(b3, ((0, 0), (0, Vp - vocab)))

    w1c = w1.astype(compute_dtype)
    w2c = w2.astype(compute_dtype)
    w3c = w3p.astype(compute_dtype)
    b1c = b1.astype(jnp.float32)
    b2c = b2.astype(jnp.float32)
    b3c = b3p.astype(jnp.float32)

    # 48 MiB keeps headroom under v7x's 64 MiB VMEM; on v5e/v6e (128 MiB) one
    # could raise this to ~96 MiB together with block_b=1024 / block_v=4096.
    vmem_limit = 48 * 1024 * 1024

    # ---- Stage 1: hidden activations --------------------------------------
    hid_cost = pl.CostEstimate(
        flops=2 * Bp * (in_dim * h1_dim + h1_dim * h2_dim),
        transcendentals=Bp * (h1_dim + h2_dim),
        bytes_accessed=(cbytes * (Bp * in_dim + in_dim * h1_dim
                                  + h1_dim * h2_dim + Bp * h2_dim)
                        + 4 * (h1_dim + h2_dim)),
    )
    h2 = pl.pallas_call(
        _hidden_kernel,
        out_shape=jax.ShapeDtypeStruct((Bp, h2_dim), compute_dtype),
        grid_spec=pltpu.PrefetchScalarGridSpec(
            num_scalar_prefetch=0,
            grid=(nbt,),
            in_specs=[
                pl.BlockSpec((tb, in_dim), lambda i: (i, 0)),       # x
                pl.BlockSpec((in_dim, h1_dim), lambda i: (0, 0)),   # W1 (invariant)
                pl.BlockSpec((1, h1_dim), lambda i: (0, 0)),        # b1 (invariant)
                pl.BlockSpec((h1_dim, h2_dim), lambda i: (0, 0)),   # W2 (invariant)
                pl.BlockSpec((1, h2_dim), lambda i: (0, 0)),        # b2 (invariant)
            ],
            out_specs=pl.BlockSpec((tb, h2_dim), lambda i: (i, 0)),
        ),
        compiler_params=pltpu.CompilerParams(
            dimension_semantics=("parallel",),
            vmem_limit_bytes=vmem_limit,
        ),
        cost_estimate=hid_cost,
    )(xp, w1c, b1c, w2c, b2c)

    # ---- Stage 2: logits ----------------------------------------------------
    log_cost = pl.CostEstimate(
        flops=2 * Bp * h2_dim * Vp,
        transcendentals=0,
        bytes_accessed=(cbytes * (nvt * Bp * h2_dim   # h2 restream per vocab tile
                                  + h2_dim * Vp)      # W3 streamed exactly once
                        + 4 * Vp                       # b3
                        + obytes * Bp * Vp),           # logits writeback
    )
    out = pl.pallas_call(
        _logits_kernel,
        out_shape=jax.ShapeDtypeStruct((Bp, Vp), out_dtype),
        grid_spec=pltpu.PrefetchScalarGridSpec(
            num_scalar_prefetch=0,
            grid=(nvt, nbt),                                   # vocab OUTER, batch INNER
            in_specs=[
                pl.BlockSpec((tb, h2_dim), lambda j, i: (i, 0)),   # h2
                pl.BlockSpec((h2_dim, tv), lambda j, i: (0, j)),   # W3: once per vocab tile
                pl.BlockSpec((1, tv), lambda j, i: (0, j)),        # b3: once per vocab tile
            ],
            out_specs=pl.BlockSpec((tb, tv), lambda j, i: (i, j)),
        ),
        compiler_params=pltpu.CompilerParams(
            dimension_semantics=("parallel", "parallel"),
            vmem_limit_bytes=vmem_limit,
        ),
        cost_estimate=log_cost,
    )(h2, w3c, b3c)

    return out[:B, :vocab]


def init_params(key, input_dim, hidden_dim_1, hidden_dim_2, len_vocab, window_size):
    """Deterministic init mirroring nn.Linear's U(-1/sqrt(fan_in), 1/sqrt(fan_in))."""
    in_feats = input_dim * window_size
    ks = jax.random.split(key, 6)

    def lin(kw, kb, fan_in, fan_out):
        bound = 1.0 / (fan_in ** 0.5)
        w = jax.random.uniform(kw, (fan_in, fan_out), jnp.float32, -bound, bound)
        b = jax.random.uniform(kb, (1, fan_out), jnp.float32, -bound, bound)
        return w, b

    w1, b1 = lin(ks[0], ks[1], in_feats, hidden_dim_1)
    w2, b2 = lin(ks[2], ks[3], hidden_dim_1, hidden_dim_2)
    w3, b3 = lin(ks[4], ks[5], hidden_dim_2, len_vocab)
    return w1, b1, w2, b2, w3, b3


def nnlm_reference(x, w1, b1, w2, b2, w3, b3):
    h1 = jnp.tanh(x @ w1 + b1)
    h2 = jnp.tanh(h1 @ w2 + b2)
    return h2 @ w3 + b3


if __name__ == "__main__":
    # Small, module-consistent shapes; batch and vocab deliberately NOT
    # multiples of the tile sizes to exercise the padding path.
    input_dim = 16
    window_size = 4          # -> W1 in_features = 64
    hidden_dim_1 = 32
    hidden_dim_2 = 32
    len_vocab = 200
    batch = 10

    key = jax.random.PRNGKey(0)
    kx, kp = jax.random.split(key)

    x = jax.random.normal(kx, (batch, input_dim * window_size), jnp.float32)
    params = init_params(kp, input_dim, hidden_dim_1, hidden_dim_2,
                         len_vocab, window_size)

    ref = nnlm_reference(x, *params)

    # Exact (f32) path — matches the module up to MXU accumulation order.
    out_f32 = jax.block_until_ready(nnlm_forward(x, *params, use_bf16=False))
    assert out_f32.shape == (batch, len_vocab)
    assert jnp.allclose(out_f32, ref, atol=2e-4, rtol=2e-4), "f32 mismatch"

    # Default fast path: bf16 weight/activation streaming, f32 accumulation.
    out_bf16 = jax.block_until_ready(nnlm_forward(x, *params))
    assert out_bf16.shape == (batch, len_vocab)
    assert jnp.allclose(out_bf16, ref, atol=2e-2, rtol=2e-2), "bf16 mismatch"

    print("KERNEL_OK")
</pallas_src>

<mosaic_0001>
module attributes {stable_mosaic.version = 11 : i64} {
  func.func @_hidden_kernel(%arg0: i32, %arg1: memref<8x64xf32, #tpu.memory_space<vmem>>, %arg2: memref<64x32xf32, #tpu.memory_space<vmem>>, %arg3: memref<1x32xf32, #tpu.memory_space<vmem>>, %arg4: memref<32x32xf32, #tpu.memory_space<vmem>>, %arg5: memref<1x32xf32, #tpu.memory_space<vmem>>, %arg6: memref<8x32xf32, #tpu.memory_space<vmem>>) attributes {dimension_semantics = [#tpu.dimension_semantics<parallel>], iteration_bounds = array<i64: 2>, scalar_prefetch = 0 : i64, scratch_operands = 0 : i64, tpu.core_type = #tpu.core_type<tc>, window_params = [{transform_indices = @transform_0, window_bounds = array<i64: 8, 64>}, {pipeline_mode = #tpu.pipeline_mode<synchronous>, transform_indices = @transform_1, window_bounds = array<i64: 64, 32>}, {pipeline_mode = #tpu.pipeline_mode<synchronous>, transform_indices = @transform_2, window_bounds = array<i64: 1, 32>}, {pipeline_mode = #tpu.pipeline_mode<synchronous>, transform_indices = @transform_3, window_bounds = array<i64: 32, 32>}, {pipeline_mode = #tpu.pipeline_mode<synchronous>, transform_indices = @transform_4, window_bounds = array<i64: 1, 32>}, {transform_indices = @transform_5, window_bounds = array<i64: 8, 32>}]} {
    %c0 = arith.constant 0 : index
    %c0_0 = arith.constant 0 : index
    %0 = vector.load %arg1[%c0, %c0_0] : memref<8x64xf32, #tpu.memory_space<vmem>>, vector<8x64xf32>
    %c0_1 = arith.constant 0 : index
    %c0_2 = arith.constant 0 : index
    %1 = vector.load %arg2[%c0_1, %c0_2] : memref<64x32xf32, #tpu.memory_space<vmem>>, vector<64x32xf32>
    %cst = arith.constant dense<0.000000e+00> : vector<8x32xf32>
    %2 = tpu.matmul %0, %1, %cst {dimension_numbers = #tpu.dot_dimension_numbers<[1], [0], [0], [1], [0, 0, 1, 1], [], []>} : vector<8x64xf32>, vector<64x32xf32>, vector<8x32xf32> -> vector<8x32xf32>
    %c0_3 = arith.constant 0 : index
    %c0_4 = arith.constant 0 : index
    %3 = vector.load %arg3[%c0_3, %c0_4] : memref<1x32xf32, #tpu.memory_space<vmem>>, vector<1x32xf32>
    %4 = vector.broadcast %3 : vector<1x32xf32> to vector<8x32xf32>
    %5 = arith.addf %2, %4 : vector<8x32xf32>
    %6 = math.tanh %5 : vector<8x32xf32>
    %c0_5 = arith.constant 0 : index
    %c0_6 = arith.constant 0 : index
    %7 = vector.load %arg4[%c0_5, %c0_6] : memref<32x32xf32, #tpu.memory_space<vmem>>, vector<32x32xf32>
    %cst_7 = arith.constant dense<0.000000e+00> : vector<8x32xf32>
    %8 = tpu.matmul %6, %7, %cst_7 {dimension_numbers = #tpu.dot_dimension_numbers<[1], [0], [0], [1], [0, 0, 1, 1], [], []>} : vector<8x32xf32>, vector<32x32xf32>, vector<8x32xf32> -> vector<8x32xf32>
    %c0_8 = arith.constant 0 : index
    %c0_9 = arith.constant 0 : index
    %9 = vector.load %arg5[%c0_8, %c0_9] : memref<1x32xf32, #tpu.memory_space<vmem>>, vector<1x32xf32>
    %10 = vector.broadcast %9 : vector<1x32xf32> to vector<8x32xf32>
    %11 = arith.addf %8, %10 : vector<8x32xf32>
    %12 = math.tanh %11 : vector<8x32xf32>
    %c0_10 = arith.constant 0 : index
    %c0_11 = arith.constant 0 : index
    %13 = vector.load %arg6[%c0_10, %c0_11] : memref<8x32xf32, #tpu.memory_space<vmem>>, vector<8x32xf32>
    tpu.vector_store %arg6[%c0_10, %c0_11], %12 {strides = array<i32>} : memref<8x32xf32, #tpu.memory_space<vmem>>, vector<8x32xf32>,
    return
  }
  func.func @transform_0(%arg0: i32) -> (i32, i32) {
    %c0_i32 = arith.constant 0 : i32
    %c0_i32_0 = arith.constant 0 : i32
    return %arg0, %c0_i32 : i32, i32
  }
  func.func @transform_1(%arg0: i32) -> (i32, i32) {
    %c0_i32 = arith.constant 0 : i32
    %c0_i32_0 = arith.constant 0 : i32
    %c0_i32_1 = arith.constant 0 : i32
    return %c0_i32, %c0_i32_0 : i32, i32
  }
  func.func @transform_2(%arg0: i32) -> (i32, i32) {
    %c0_i32 = arith.constant 0 : i32
    %c0_i32_0 = arith.constant 0 : i32
    %c0_i32_1 = arith.constant 0 : i32
    return %c0_i32, %c0_i32_0 : i32, i32
  }
  func.func @transform_3(%arg0: i32) -> (i32, i32) {
    %c0_i32 = arith.constant 0 : i32
    %c0_i32_0 = arith.constant 0 : i32
    %c0_i32_1 = arith.constant 0 : i32
    return %c0_i32, %c0_i32_0 : i32, i32
  }
  func.func @transform_4(%arg0: i32) -> (i32, i32) {
    %c0_i32 = arith.constant 0 : i32
    %c0_i32_0 = arith.constant 0 : i32
    %c0_i32_1 = arith.constant 0 : i32
    return %c0_i32, %c0_i32_0 : i32, i32
  }
  func.func @transform_5(%arg0: i32) -> (i32, i32) {
    %c0_i32 = arith.constant 0 : i32
    %c0_i32_0 = arith.constant 0 : i32
    return %arg0, %c0_i32 : i32, i32
  }
}

module attributes {stable_mosaic.version = 11 : i64} {
  func.func @_logits_kernel(%arg0: i32, %arg1: i32, %arg2: memref<8x32xf32, #tpu.memory_space<vmem>>, %arg3: memref<32x256xf32, #tpu.memory_space<vmem>>, %arg4: memref<1x256xf32, #tpu.memory_space<vmem>>, %arg5: memref<8x256xf32, #tpu.memory_space<vmem>>) attributes {dimension_semantics = [#tpu.dimension_semantics<parallel>, #tpu.dimension_semantics<parallel>], iteration_bounds = array<i64: 1, 2>, scalar_prefetch = 0 : i64, scratch_operands = 0 : i64, tpu.core_type = #tpu.core_type<tc>, window_params = [{transform_indices = @transform_0, window_bounds = array<i64: 8, 32>}, {transform_indices = @transform_1, window_bounds = array<i64: 32, 256>}, {transform_indices = @transform_2, window_bounds = array<i64: 1, 256>}, {transform_indices = @transform_3, window_bounds = array<i64: 8, 256>}]} {
    %c0 = arith.constant 0 : index
    %c0_0 = arith.constant 0 : index
    %0 = vector.load %arg2[%c0, %c0_0] : memref<8x32xf32, #tpu.memory_space<vmem>>, vector<8x32xf32>
    %c0_1 = arith.constant 0 : index
    %c0_2 = arith.constant 0 : index
    %1 = vector.load %arg3[%c0_1, %c0_2] : memref<32x256xf32, #tpu.memory_space<vmem>>, vector<32x256xf32>
    %cst = arith.constant dense<0.000000e+00> : vector<8x256xf32>
    %2 = tpu.matmul %0, %1, %cst {dimension_numbers = #tpu.dot_dimension_numbers<[1], [0], [0], [1], [0, 0, 1, 1], [], []>} : vector<8x32xf32>, vector<32x256xf32>, vector<8x256xf32> -> vector<8x256xf32>
    %c0_3 = arith.constant 0 : index
    %c0_4 = arith.constant 0 : index
    %3 = vector.load %arg4[%c0_3, %c0_4] : memref<1x256xf32, #tpu.memory_space<vmem>>, vector<1x256xf32>
    %4 = vector.broadcast %3 : vector<1x256xf32> to vector<8x256xf32>
    %5 = arith.addf %2, %4 : vector<8x256xf32>
    %c0_5 = arith.constant 0 : index
    %c0_6 = arith.constant 0 : index
    %6 = vector.load %arg5[%c0_5, %c0_6] : memref<8x256xf32, #tpu.memory_space<vmem>>, vector<8x256xf32>
    tpu.vector_store %arg5[%c0_5, %c0_6], %5 {strides = array<i32>} : memref<8x256xf32, #tpu.memory_space<vmem>>, vector<8x256xf32>,
    return
  }
  func.func @transform_0(%arg0: i32, %arg1: i32) -> (i32, i32) {
    %c0_i32 = arith.constant 0 : i32
    %c0_i32_0 = arith.constant 0 : i32
    return %arg1, %c0_i32 : i32, i32
  }
  func.func @transform_1(%arg0: i32, %arg1: i32) -> (i32, i32) {
    %c0_i32 = arith.constant 0 : i32
    %c0_i32_0 = arith.constant 0 : i32
    return %c0_i32, %arg0 : i32, i32
  }
  func.func @transform_2(%arg0: i32, %arg1: i32) -> (i32, i32) {
    %c0_i32 = arith.constant 0 : i32
    %c0_i32_0 = arith.constant 0 : i32
    return %c0_i32, %arg0 : i32, i32
  }
  func.func @transform_3(%arg0: i32, %arg1: i32) -> (i32, i32) {
    %c0_i32 = arith.constant 0 : i32
    return %arg1, %arg0 : i32, i32
  }
}

</mosaic_0001>

<bundles_post_ra>
// kernel: nnlm_forward.2
= control target key start
LH: loop header
LB: loop body
LE: loop exit
PB: predicated region body
PF: predicated region fallthrough
CT: control target
= control target key end

     0   :  { %s582_s18 = smov 0   ;;  %s648_s0 = inlined_call_operand.vmem [shape: f32[16,64], index: 0, kind: input, shape index: {}]   ;;  %s649_s1 = inlined_call_operand.vmem [shape: f32[64,32], index: 1, kind: input, shape index: {}]   ;;  %s650_s2 = inlined_call_operand.vmem [shape: f32[1,32], index: 2, kind: input, shape index: {}]   ;;  %s651_s3 = inlined_call_operand.vmem [shape: f32[32,32], index: 3, kind: input, shape index: {}]   ;;  %s652_s4 = inlined_call_operand.vmem [shape: f32[1,32], index: 4, kind: input, shape index: {}]   ;;  %s653_s5 = inlined_call_operand.vmem [shape: f32[16,32], index: 5, kind: output, shape index: {}]  }
   0x1 LB: > { %s451_s19 = sadd.s32 4294967295, %s547_s18   ;;  %p455_p0 = scmp.ge.s32.totalorder %s547_s18, 1  ;;  %s547_s18 = sphi %s582_s18, %s15_s18  }
   0x2   : > { %p186_p1 = scmp.lt.s32.totalorder %s547_s18, 3 }
   0x4   : > { %p187_p2 = pnand %p455_p0, %p186_p1 }
   0x5   : > { %v221_v0 = vld [vmem:[%s649_s1] sm:$0xff] (!%p187_p2)  ;;  %v222_v1 = vld [vmem:[%s649_s1 + $0x8] sm:$0xff] (!%p187_p2)  ;;  %v223_v2 = vld [vmem:[%s649_s1 + $0x10] sm:$0xff] (!%p187_p2)  ;;  %v549_v3 = vmov (!%p187_p2), 0.0|0.0   ;;  %vm550_vm0 = vmmov (!%p187_p2), 0   ;;  %v551_v6 = vmov (!%p187_p2), 0.0  }
   0x6   : > { %190 = sbr.rel (%p187_p2) target bundleno = 474 (0x1da), region = 40  ;;  %508 = vmatprep.subr.bf16.mxu0 (!%p187_p2), %v549_v3  ;;  %v509_v4 = vpack.c.bf16 (!%p187_p2), %v222_v1, %v221_v0  ;;  %v224_v5 = vld [vmem:[%s649_s1 + $0x18] sm:$0xff] (!%p187_p2)  ;;  %494 = vmatprep.mubr.msk.f32.mxu0 (!%p187_p2), %vm550_vm0, %v551_v6  ;;  %p212_p3 = scmp.lt.s32.totalorder (!%p187_p2), %s451_s19, 1  ;;  %v225_v8 = vld [vmem:[%s649_s1 + $0x20] sm:$0xff] (!%p187_p2)  ;;  %v226_v9 = vld [vmem:[%s649_s1 + $0x28] sm:$0xff] (!%p187_p2)  ;;  %vm236_vm1 = vcmask (!%p187_p2), 523264  }
   0x7   : > { %520 = vmatprep.subr.bf16.mxu1 (!%p187_p2), %v549_v3  ;;  %505 = vmatprep.mubr.msk.f32.mxu1 (!%p187_p2), %vm550_vm0, %v551_v6  ;;  %v512_v7 = vpack.c.bf16 (!%p187_p2), %v224_v5, %v223_v2  ;;  %v515_v10 = vpack.c.bf16 (!%p187_p2), %v226_v9, %v225_v8  ;;  %v227_v11 = vld [vmem:[%s649_s1 + $0x30] sm:$0xff] (!%p187_p2)  ;;  %v228_v12 = vld [vmem:[%s649_s1 + $0x38] sm:$0xff] (!%p187_p2)  ;;  %v311_v15 = vld [vmem:[%s651_s3] sm:$0xff] (!%p187_p2)  ;;  %vm322_vm2 = vcmask (!%p187_p2), 261120  }
   0x8   : > { %510 = vmatpush3.bf16.msra.mxu0 (!%p187_p2), %v509_v4  ;;  %v518_v13 = vpack.c.bf16 (!%p187_p2), %v228_v12, %v227_v11  ;;  %v312_v16 = vld [vmem:[%s651_s3 + $0x8] sm:$0xff] (!%p187_p2)  ;;  %v313_v17 = vld [vmem:[%s651_s3 + $0x10] sm:$0xff] (!%p187_p2)  ;;  %v314_v19 = vld [vmem:[%s651_s3 + $0x18] sm:$0xff] (!%p187_p2) }
   0x9   : > { %511 = vmatprep.subr.bf16.mxu0 (!%p187_p2), %v549_v3  ;;  %v521_v18 = vpack.c.bf16 (!%p187_p2), %v312_v16, %v311_v15  ;;  %v524_v20 = vpack.c.bf16 (!%p187_p2), %v314_v19, %v313_v17  ;;  %v458_v21 = vld [vmem:[%s650_s2] ss:$0 sm:$0xff] (!%p187_p2) }
   0xa   : > { %v460_v26 = vld [vmem:[%s652_s4] ss:$0 sm:$0xff] (!%p187_p2) }
   0xb   : > { %522 = vmatpush3.bf16.msra.mxu1 (!%p187_p2), %v521_v18 }
   0xc   : > { %513 = vmatpush3.bf16.msra.mxu0 (!%p187_p2), %v512_v7  ;;  %523 = vmatprep.subr.bf16.mxu1 (!%p187_p2), %v549_v3 }
   0xd   : > { %s655_s19 = smov (!%p212_p3, %s451_s19), 1  ;;  %514 = vmatprep.subr.bf16.mxu0 %v549_v3 }
   0xe   : > { %s456_s11 = sshll.u32 %s655_s19, 3 }
   0xf   : > { %s215_s14 = scalar_lea.vmem %s648_s0, %s456_s11  ;;  %525 = vmatpush3.bf16.msra.mxu1 %v524_v20  ;;  %s219_s6 = scalar_lea.vmem %s653_s5, %s456_s11 }
  0x10   : > { %516 = vmatpush3.bf16.msra.mxu0 %v515_v10  ;;  %v220_v14 = vld [vmem:[%s215_s14] sm:$0xff] }
  0x11   : > { %517 = vmatprep.subr.bf16.mxu0 %v549_v3 }
  0x14   : > { %519 = vmatpush3.bf16.msra.mxu0 %v518_v13 }
  0x17   : > { %495 = vmatmul.mubr.msk.f32.vlgmr.msra.gmra.mrb[0].mxu0 %vm236_vm1, %v220_v14 }
  0xea   : > { %v306_v22 = vpop.f32.mrb[0].mxu0 }
  0xeb   : > { %v307_v23 = vadd.f32 %v458_v21, %v306_v22  ;;  %v496_v24 = vpop.f32.mrb[1].mxu0 }
  0xed   : > { %537 = vtanh.f32 %v307_v23 }
  0xf7   : > { %v538_v25 = vpop.eup %537 }
  0xf8   : > { %506 = vmatmul.mubr.msk.f32.vlgmr.msra.gmra.mrb[0].mxu1 %vm322_vm2, %v538_v25 }
 0x1cb   : > { %v392_v27 = vpop.f32.mrb[0].mxu1 }
 0x1cc   : > { %v393_v28 = vadd.f32 %v460_v26, %v392_v27  ;;  %v507_v29 = vpop.f32.mrb[1].mxu1 }
 0x1ce   : > { %539 = vtanh.f32 %v393_v28 }
 0x1d8   : > { %v540_v30 = vpop.eup %539 }
 0x1d9   : > { %397 = vst.msk [vmem:[%s219_s6] sm:$0xff] %vm322_vm2, %v540_v30 }
 0x1da PF: > { %s15_s18 = sadd.s32 1, %s547_s18  }
 0x1db   : > { %p12_p4 = scmp.ge.s32.totalorder %s15_s18, 4  }
 0x1dd   :  { %14 = sbr.rel (!%p12_p4) target bundleno = 1 (0x1), region = 70 }

// kernel: nnlm_forward.3
= control target key start
LH: loop header
LB: loop body
LE: loop exit
PB: predicated region body
PF: predicated region fallthrough
CT: control target
= control target key end

     0   :  { %8 = vsyncpa [#allocation3], 0  ;;  %s755_s0 = inlined_call_operand.vmem [shape: f32[16,32], index: 0, kind: input, shape index: {}]   ;;  %s756_s1 = inlined_call_operand.vmem [shape: f32[32,256], index: 1, kind: input, shape index: {}]   ;;  %s757_s2 = inlined_call_operand.vmem [shape: f32[1,256], index: 2, kind: input, shape index: {}]   ;;  %s758_s3 = inlined_call_operand.hbm [shape: f32[16,256], index: 3, kind: output, shape index: {}]  }
   0x1   :  { %10 = vsyncpa [#allocation3 + $0x1], 0  ;;  %s616_s12 = smov 0   ;;  %s618_s13 = smov 0  }
   0x2   :  { %s620_s14 = smov 0   ;;  %s622_s15 = smov 0  }
   0x3   :  { %s624_s16 = smov 0   ;;  %s626_s17 = smov 0  }
   0x4 LB: > { %s434_s18 = sadd.s32 4294967295, %s592_s17   ;;  %s435_s19 = sadd.s32 4294967294, %s592_s17   ;;  %s592_s17 = sphi %s626_s17, %s16_s17   ;;  %s588_s16 = sphi %s624_s16, %s765_s16   ;;  %s584_s15 = sphi %s622_s15, %s764_s15   ;;  %s580_s14 = sphi %s620_s14, %s763_s14   ;;  %s576_s13 = sphi %s618_s13, %s762_s13   ;;  %s572_s12 = sphi %s616_s12, %s761_s12  }
   0x5   : > { %s25_s20 = sadd.s32 1, %s588_s16  ;;  %s115_s21 = sadd.s32 1, %s580_s14 }
   0x6   : > { %p26_p0 = scmp.ge.s32.totalorder %s25_s20, 2  ;;  %p125_p1 = scmp.ne.s32.totalorder %s580_s14, %s576_s13 }
   0x7   : > { %p126_p2 = scmp.eq.s32.totalorder %s434_s18, 1  ;;  %p131_p3 = scmp.ne.s32.totalorder %s576_s13, %s572_s12 }
   0x8   : > { %s767_s20 = smov (%p26_p0, %s25_s20), 0  ;;  %p132_p5 = scmp.eq.s32.totalorder %s435_s19, 1 }
   0x9   : > { %p656_p4 = por %p126_p2, %p125_p1  ;;  %s110_s23 = ssub.s32 %s588_s16, %s767_s20 }
   0xa   : > { %p440_p6 = scmp.ge.s32.totalorder %s592_s17, 1  ;;  %p113_p7 = scmp.eq.s32.totalorder %s110_s23, 0 }
   0xb   : > { %p663_p8 = por %p132_p5, %p131_p3  ;;  %p174_p9 = scmp.lt.s32.totalorder %s592_s17, 3 }
   0xc   : > { %s669_s25 = scalar_select %p113_p7, %s580_s14, %s115_s21  }
   0xd   : > { %p175_p10 = pnand %p440_p6, %p174_p9 }
   0xe   : > { %v224_v0 = vld [vmem:[%s756_s1 + $0x8] sm:$0xff] (!%p175_p10)  ;;  %v226_v1 = vld [vmem:[%s756_s1 + $0x18] sm:$0xff] (!%p175_p10)  ;;  %v223_v2 = vld [vmem:[%s756_s1] sm:$0xff] (!%p175_p10)  ;;  %p206_p11 = scmp.lt.s32.totalorder (!%p175_p10), %s584_s15, 1  ;;  %v594_v7 = vmov (!%p175_p10), 0.0   ;;  %vm243_vm0 = vcmask (!%p175_p10), 261120   ;;  %v233_v14 = vlaneseq (!%p175_p10) }
   0xf   : > { %178 = sbr.rel (%p175_p10) target bundleno = 256 (0x100), region = 32  ;;  %v450_v3 = vpack.c.bf16 (!%p175_p10), %v226_v1, %v224_v0  ;;  %v225_v4 = vld [vmem:[%s756_s1 + $0x10] sm:$0xff] (!%p175_p10)  ;;  %v228_v5 = vld [vmem:[%s756_s1 + $0x28] sm:$0xff] (!%p175_p10)  ;;  %v230_v6 = vld [vmem:[%s756_s1 + $0x38] sm:$0xff] (!%p175_p10)  ;;  %311 = vmatprep.mubr.f32.mxu0 (!%p175_p10), %v594_v7  ;;  %s203_s30 = sand.u32 (!%p175_p10), 1, %s576_s13  }
  0x10   : > { %v452_v8 = vpack.c.bf16 (!%p175_p10), %v225_v4, %v223_v2  ;;  %v454_v9 = vpack.c.bf16 (!%p175_p10), %v230_v6, %v228_v5  ;;  %v227_v10 = vld [vmem:[%s756_s1 + $0x20] sm:$0xff] (!%p175_p10)  ;;  %v229_v11 = vld [vmem:[%s756_s1 + $0x30] sm:$0xff] (!%p175_p10)  ;;  %v234_v15 = vshrl.u32 (!%p175_p10), %v233_v14, 7  ;;  %s441_s4 = sshll.u32 (!%p175_p10), %s203_s30, 4  ;;  %s449_s7 = sshll.u32 (!%p175_p10), %s584_s15, 8 }
  0x11   : > { %451 = vmatprep.subr.bf16.mxu0 (!%p175_p10), %v450_v3  ;;  %v456_v12 = vpack.c.bf16 (!%p175_p10), %v229_v11, %v227_v10  ;;  %v231_v17 = vld [vmem:[%s757_s2] sm:$0x3] (!%p175_p10)  ;;  %s205_s8 = scalar_lea.vmem (!%p175_p10), [#allocation2], %s441_s4  ;;  %s708_s18 = scalar_lea.hbm (!%p175_p10), %s758_s3, %s449_s7 }
  0x12   : > { %453 = vmatpush1.bf16.msra.mxu0 (!%p175_p10), %v452_v8  ;;  %v235_v16 = vsub.s32 (!%p175_p10), 0, %v234_v15  ;;  %v239_v18 = vsub.s32 (!%p175_p10), 1, %v234_v15  ;;  %s337_s9 = sshll.u32 (!%p175_p10), %s205_s8, 4  ;;  %s321_s19 = scalar_lea.sflag (!%p175_p10), [#allocation3], %s203_s30  ;;  %s710_s9 = int_to_ptr.vmem [resolvable:$true] %s337_s9 }
  0x13   : > { %455 = vmatprep.subr.bf16.mxu0 (!%p175_p10), %v454_v9  ;;  %s595_s21 = smov (!%p175_p10), [#allocation2]  }
  0x14   : > { %v236_v19 = vrot.slane (!%p175_p10), %v231_v17, %v235_v16  ;;  %v240_v20 = vrot.slane (!%p175_p10), %v231_v17, %v239_v18 }
  0x16   : > { %s207_s23 = scalar_select %p206_p11, %s584_s15, 1  ;;  %457 = vmatpush1.bf16.msra.mxu0 %v456_v12 }
  0x17   : > { %s514_s15 = scalar_lea.vmem %s710_s9, 256 }
  0x18   : > { %s442_s26 = sshll.u32 %s207_s23, 3  ;;  %p515_p12 = scmp.ne.s32.totalorder %s710_s9, %s514_s15 }
  0x19   : > { %s209_s29 = scalar_lea.vmem %s755_s0, %s442_s26  ;;  %s518_s23 = sshll.u32 %s595_s21, 4  ;;  %s519_s23 = int_to_ptr.vmem [resolvable:$false] %s518_s23 }
  0x1a   : > { %v222_v13 = vld [vmem:[%s209_s29] sm:$0xff]  ;;  %p516_p13 = pnand %p515_p12, %p656_p4  ;;  %s520_s26 = scalar_lea.vmem %s519_s23, 512 }
  0x1b   : > { %443 = vmatmul.mubr.msk.f32.vlgmr.msra.gmra.mrb[0].mxu0 %vm243_vm0, %v222_v13  ;;  %p521_p1 = scmp.lt.s32.totalorder %s710_s9, %s519_s23  ;;  %p522_p2 = scmp.lt.s32.totalorder %s520_s26, %s514_s15 }
  0x1c   : > { %p517_p0 = pneg %p516_p13 }
  0x1d   : > { %p523_p3 = por %p522_p2, %p521_p1 }
  0x1f   : > { %p524_p5 = pnand %p523_p3, %p517_p0 }
  0xee   : > { %v313_v21 = vpop.f32.mrb[0].mxu0 }
  0xef   : > { %v314_v22 = vadd.f32 %v313_v21, %v236_v19  ;;  %v315_v23 = vpop.f32.mrb[1].mxu0 }
  0xf0   : > { %v316_v24 = vadd.f32 %v315_v23, %v240_v20 }
  0xf1   : > { %318 = vst [vmem:[%s205_s8] sm:$0xff] %v314_v22 }
  0xf2   : > { %319 = vst [vmem:[%s205_s8 + $0x8] sm:$0xff] %v316_v24 }
  0xf3   : > { %527 = shalt.err (!%p524_p5)
}
  0xf4   : > { %s528_s27 = scalar_lea.hbm %s708_s18, 256  ;;  %s532_s30 = scalar_lea.hbm %s758_s3, 512 }
  0xf5   : > { %p529_p6 = scmp.ne.s32.totalorder %s708_s18, %s528_s27  ;;  %p533_p10 = scmp.lt.u32.totalorder %s708_s18, %s758_s3 }
  0xf6   : > { %p534_p11 = scmp.lt.u32.totalorder %s532_s30, %s528_s27  ;;  %p536_p13 = scmp.lt.u32.totalorder %s528_s27, %s708_s18 }
  0xf7   : > { %p530_p7 = pnand %p529_p6, %p656_p4 }
  0xf8   : > { %p535_p12 = por %p534_p11, %p533_p10 }
  0xf9   : > { %p531_p9 = pneg %p530_p7 }
  0xfa   : > { %p537_p0 = por %p536_p13, %p535_p12 }
  0xfc   : > { %p538_p1 = pnand %p537_p0, %p531_p9 }
  0xfe   : > { %541 = shalt.err (!%p538_p1)
}
  0xff   : > { %458 = dma.vmem_to_hbm [thread:$0]  (%p656_p4), %s710_s9, 256, %s708_s18, %s321_s19  }
 0x100 PF: > { %p464_p2 = scmp.ge.s32.totalorder %s592_s17, 2  ;;  %s349_s6 = sand.u32 1, %s572_s12  }
 0x101   : > { %s350_s7 = scalar_lea.sflag [#allocation3], %s349_s6 }
 0x102   : > { %p461_p3 = pnand %p464_p2, %p663_p8 }
 0x104   : > { %567 = dma.done.wait (!%p461_p3), %s350_s7, 256  }
 0x105   : > { %569 = vsyncadd (!%p461_p3), %s350_s7, 4294967040  ;;  %s16_s17 = sadd.s32 1, %s592_s17   ;;  %s761_s12 = smov %s576_s13 }
 0x106   : > { %p13_p5 = scmp.ge.s32.totalorder %s16_s17, 4   ;;  %s762_s13 = smov %s580_s14 }
 0x107   : > { %s763_s14 = smov %s669_s25  ;;  %s764_s15 = smov %s588_s16 }
 0x108   : > { %s765_s16 = smov %s767_s20  ;;  %15 = sbr.rel (!%p13_p5) target bundleno = 4 (0x4), region = 73 }
 0x10f   :  { %355 = vsyncpa [#allocation3], 1 }
 0x110   :  { %357 = vsyncpa [#allocation3 + $0x1], 1 }

</bundles_post_ra>
